<compile_context>
chip_gen: v6e
topology: v6e:2x2x1
jax: 0.10.0
libtpu: 0.0.40
codegen_flags: <defaults>
</compile_context>

<pallas_src>
import functools

import jax
import jax.numpy as jnp
from jax.experimental import pallas as pl
from jax.experimental.pallas import tpu as pltpu

HIDDEN = 512


def _round_up(x, m):
    return (x + m - 1) // m * m


def _default_act_dtype():
    """Use bf16 activation math only where the VPU/EUP have a bf16 path."""
    try:
        kind = jax.devices()[0].device_kind.lower()
    except Exception:
        return jnp.float32
    if ("v6" in kind) or ("v7" in kind) or ("7x" in kind):
        return jnp.bfloat16
    return jnp.float32


def _mlp_decoder_kernel(x_ref, w1_ref, b1_ref, w2_ref, b2_ref, w3_ref, b3_ref,
                        o_ref):
    # Weights/biases arrive pre-scaled by 0.5, so
    #   sigmoid(x @ W + b) == 0.5 * tanh(x @ (W/2) + b/2) + 0.5
    # i.e. one EUP tanh plus a mul/add, with no extra 0.5*h pre-scale.
    # The activation dtype (bf16 on v6e/v7x, f32 on v5e) is carried by the
    # bias dtype; its output directly feeds the next matmul's bf16 LHS.
    def act(acc_f32, b_ref):
        h = acc_f32.astype(b_ref.dtype) + b_ref[...]
        return jnp.tanh(h) * 0.5 + 0.5

    x = x_ref[...]                                                   # bf16
    h1 = act(jnp.dot(x, w1_ref[...],
                     preferred_element_type=jnp.float32), b1_ref)
    h2 = act(jnp.dot(h1.astype(jnp.bfloat16), w2_ref[...],
                     preferred_element_type=jnp.float32), b2_ref)
    h3 = act(jnp.dot(h2.astype(jnp.bfloat16), w3_ref[...],
                     preferred_element_type=jnp.float32), b3_ref)
    o_ref[...] = h3.astype(o_ref.dtype)


def prepare_params(params, *, act_dtype=None):
    """One-time operand prep (hoisted out of the per-step forward):
       * fold the sigmoid 0.5 pre-scale into weights and biases,
       * cast weights to bf16 for the MXU,
       * pad d_in / d_out to multiples of 128 (lane-dense x tile & output),
       * biases in the activation dtype (bf16 on v6e/v7x, f32 otherwise).
    Weights are stored transposed vs. PyTorch: W has shape (in, out), so
    y = x @ W + b matches nn.Linear's y = x @ W_pt.T + b.
    """
    if act_dtype is None:
        act_dtype = _default_act_dtype()
    d_in = params["w1"].shape[0]
    d_out = params["w3"].shape[1]
    d_in_pad = _round_up(d_in, 128)
    d_out_pad = _round_up(d_out, 128)

    w1 = jnp.pad(params["w1"], ((0, d_in_pad - d_in), (0, 0)))
    w3 = jnp.pad(params["w3"], ((0, 0), (0, d_out_pad - d_out)))
    b3 = jnp.pad(params["b3"], ((0, d_out_pad - d_out),))
    return dict(
        w1=(0.5 * w1).astype(jnp.bfloat16),
        w2=(0.5 * params["w2"]).astype(jnp.bfloat16),
        w3=(0.5 * w3).astype(jnp.bfloat16),
        b1=(0.5 * params["b1"]).reshape(1, HIDDEN).astype(act_dtype),
        b2=(0.5 * params["b2"]).reshape(1, HIDDEN).astype(act_dtype),
        b3=(0.5 * b3).reshape(1, d_out_pad).astype(act_dtype),
    )


@functools.partial(jax.jit, static_argnames=("d_out", "block_b"))
def mlp_decoder_forward(x, prep, *, d_out, block_b=1024):
    """x: (B, input_dim) float32.  prep: output of prepare_params().
    d_out: true (unpadded) output dimension."""
    assert block_b >= 128 and block_b % 128 == 0, "block_b must be a multiple of 128"
    B, d_in = x.shape
    d_in_pad = prep["w1"].shape[0]
    d_out_pad = prep["w3"].shape[1]
    out_dtype = x.dtype

    # ---- batch tiling ----
    if B < 512:
        # Not enough rows to keep two TensorCores busy: one tile, 16-row
        # aligned (bf16 sublane packing minimum).
        bb = _round_up(B, 16)
        grid_m = 1
    else:
        # Even number of minimally padded, 128-aligned tiles: both v7x TCs get
        # work on the ("parallel",) axis and padding stays < 128 rows/step.
        grid_m = max(2, -(-B // block_b))
        grid_m += grid_m % 2
        bb = _round_up(-(-B // grid_m), 128)
    padded_b = bb * grid_m

    # Pad + cast x; allow_input_fusion lets this fuse into the pallas_call
    # input stream instead of costing a separate HBM round trip.
    if padded_b != B or d_in_pad != d_in:
        x = jnp.pad(x, ((0, padded_b - B), (0, d_in_pad - d_in)))
    x_bf = x.astype(jnp.bfloat16)

    # ---- advisory cost estimate (helps XLA schedule around the call) ----
    bias_bytes = jnp.dtype(prep["b1"].dtype).itemsize
    flops = 2 * padded_b * (d_in_pad * HIDDEN + HIDDEN * HIDDEN + HIDDEN * d_out_pad)
    transcendentals = padded_b * (2 * HIDDEN + d_out_pad)
    bytes_accessed = (
        padded_b * d_in_pad * 2                                          # x (bf16)
        + (d_in_pad * HIDDEN + HIDDEN * HIDDEN + HIDDEN * d_out_pad) * 2  # weights
        + (2 * HIDDEN + d_out_pad) * bias_bytes                           # biases
        + padded_b * d_out_pad * jnp.dtype(out_dtype).itemsize            # output
    )

    out = pl.pallas_call(
        _mlp_decoder_kernel,
        out_shape=jax.ShapeDtypeStruct((padded_b, d_out_pad), out_dtype),
        grid_spec=pltpu.PrefetchScalarGridSpec(
            num_scalar_prefetch=0,
            grid=(grid_m,),
            in_specs=[
                pl.BlockSpec((bb, d_in_pad), lambda i: (i, 0)),        # x tile
                pl.BlockSpec((d_in_pad, HIDDEN), lambda i: (0, 0)),    # w1 (resident)
                pl.BlockSpec((1, HIDDEN), lambda i: (0, 0)),           # b1
                pl.BlockSpec((HIDDEN, HIDDEN), lambda i: (0, 0)),      # w2
                pl.BlockSpec((1, HIDDEN), lambda i: (0, 0)),           # b2
                pl.BlockSpec((HIDDEN, d_out_pad), lambda i: (0, 0)),   # w3
                pl.BlockSpec((1, d_out_pad), lambda i: (0, 0)),        # b3
            ],
            out_specs=pl.BlockSpec((bb, d_out_pad), lambda i: (i, 0)),
        ),
        compiler_params=pltpu.CompilerParams(
            dimension_semantics=("parallel",),
            vmem_limit_bytes=48 << 20,   # above v5e's 16 MiB scoped default
            allow_input_fusion=[True] + [False] * 6,
        ),
        cost_estimate=pl.CostEstimate(
            flops=flops,
            transcendentals=transcendentals,
            bytes_accessed=bytes_accessed,
        ),
    )(x_bf, prep["w1"], prep["b1"], prep["w2"], prep["b2"], prep["w3"], prep["b3"])

    # TODO(synk): a consumer that tolerates padding could take the
    # (padded_b, d_out_pad) block directly and skip this extra slice pass.
    return out[:B, :d_out]


def init_params(key, input_dim, output_dim):
    """Deterministic init mimicking nn.Linear's U(-1/sqrt(fan_in), 1/sqrt(fan_in))."""
    ks = jax.random.split(key, 6)

    def linear(kw, kb, fan_in, fan_out):
        bound = 1.0 / jnp.sqrt(fan_in)
        w = jax.random.uniform(kw, (fan_in, fan_out), jnp.float32, -bound, bound)
        b = jax.random.uniform(kb, (fan_out,), jnp.float32, -bound, bound)
        return w, b

    w1, b1 = linear(ks[0], ks[1], input_dim, HIDDEN)
    w2, b2 = linear(ks[2], ks[3], HIDDEN, HIDDEN)
    w3, b3 = linear(ks[4], ks[5], HIDDEN, output_dim)
    return dict(w1=w1, b1=b1, w2=w2, b2=b2, w3=w3, b3=b3)


def _reference_forward(x, params):
    h1 = jax.nn.sigmoid(x @ params["w1"] + params["b1"])
    h2 = jax.nn.sigmoid(h1 @ params["w2"] + params["b2"])
    return jax.nn.sigmoid(h2 @ params["w3"] + params["b3"])


if __name__ == "__main__":
    key = jax.random.PRNGKey(0)
    k_param, k_x1, k_x2 = jax.random.split(key, 3)

    input_dim = 32     # e.g. latent dim fed to the decoder
    output_dim = 64    # e.g. flattened image patch dim
    params = init_params(k_param, input_dim, output_dim)
    prep = prepare_params(params)   # one-time bf16 / pad / 0.5-fold prep

    # Small-shape check (exercises batch, d_in and d_out padding, grid_m = 1).
    x_small = jax.random.normal(k_x1, (8, input_dim), jnp.float32)
    out_small = jax.block_until_ready(
        mlp_decoder_forward(x_small, prep, d_out=output_dim))
    ref_small = _reference_forward(x_small, params)
    assert out_small.shape == (8, output_dim)
    # bf16 matmul inputs (+ bf16 activation math on v6e/v7x) vs. f32 reference.
    assert jnp.allclose(out_small, ref_small, atol=2.5e-2, rtol=0), (
        float(jnp.max(jnp.abs(out_small - ref_small))))

    # Larger batch exercises the even, minimally padded multi-tile path
    # (grid_m = 2, bb = 384, zero batch padding).
    x_big = jax.random.normal(k_x2, (768, input_dim), jnp.float32)
    out_big = jax.block_until_ready(
        mlp_decoder_forward(x_big, prep, d_out=output_dim))
    ref_big = _reference_forward(x_big, params)
    assert out_big.shape == (768, output_dim)
    assert jnp.allclose(out_big, ref_big, atol=2.5e-2, rtol=0), (
        float(jnp.max(jnp.abs(out_big - ref_big))))

    print("KERNEL_OK")
</pallas_src>

<mosaic_0001>
module attributes {stable_mosaic.version = 11 : i64} {
  func.func @_mlp_decoder_kernel(%arg0: i32, %arg1: memref<16x128xbf16, #tpu.memory_space<vmem>>, %arg2: memref<128x512xbf16, #tpu.memory_space<vmem>>, %arg3: memref<1x512xf32, #tpu.memory_space<vmem>>, %arg4: memref<512x512xbf16, #tpu.memory_space<vmem>>, %arg5: memref<1x512xf32, #tpu.memory_space<vmem>>, %arg6: memref<512x128xbf16, #tpu.memory_space<vmem>>, %arg7: memref<1x128xf32, #tpu.memory_space<vmem>>, %arg8: memref<16x128xf32, #tpu.memory_space<vmem>>) attributes {dimension_semantics = [#tpu.dimension_semantics<parallel>], iteration_bounds = array<i64: 1>, scalar_prefetch = 0 : i64, scratch_operands = 0 : i64, tpu.core_type = #tpu.core_type<tc>, window_params = [{transform_indices = @transform_0, window_bounds = array<i64: 16, 128>}, {pipeline_mode = #tpu.pipeline_mode<synchronous>, transform_indices = @transform_1, window_bounds = array<i64: 128, 512>}, {pipeline_mode = #tpu.pipeline_mode<synchronous>, transform_indices = @transform_2, window_bounds = array<i64: 1, 512>}, {pipeline_mode = #tpu.pipeline_mode<synchronous>, transform_indices = @transform_3, window_bounds = array<i64: 512, 512>}, {pipeline_mode = #tpu.pipeline_mode<synchronous>, transform_indices = @transform_4, window_bounds = array<i64: 1, 512>}, {pipeline_mode = #tpu.pipeline_mode<synchronous>, transform_indices = @transform_5, window_bounds = array<i64: 512, 128>}, {pipeline_mode = #tpu.pipeline_mode<synchronous>, transform_indices = @transform_6, window_bounds = array<i64: 1, 128>}, {transform_indices = @transform_7, window_bounds = array<i64: 16, 128>}]} {
    %c0 = arith.constant 0 : index
    %c0_0 = arith.constant 0 : index
    %0 = vector.load %arg1[%c0, %c0_0] : memref<16x128xbf16, #tpu.memory_space<vmem>>, vector<16x128xbf16>
    %c0_1 = arith.constant 0 : index
    %c0_2 = arith.constant 0 : index
    %1 = vector.load %arg2[%c0_1, %c0_2] : memref<128x512xbf16, #tpu.memory_space<vmem>>, vector<128x512xbf16>
    %cst = arith.constant dense<0.000000e+00> : vector<16x512xf32>
    %2 = tpu.matmul %0, %1, %cst {dimension_numbers = #tpu.dot_dimension_numbers<[1], [0], [0], [1], [0, 0, 1, 1], [], []>} : vector<16x128xbf16>, vector<128x512xbf16>, vector<16x512xf32> -> vector<16x512xf32>
    %c0_3 = arith.constant 0 : index
    %c0_4 = arith.constant 0 : index
    %3 = vector.load %arg3[%c0_3, %c0_4] : memref<1x512xf32, #tpu.memory_space<vmem>>, vector<1x512xf32>
    %4 = vector.broadcast %3 : vector<1x512xf32> to vector<16x512xf32>
    %5 = arith.addf %2, %4 : vector<16x512xf32>
    %6 = math.tanh %5 : vector<16x512xf32>
    %cst_5 = arith.constant 5.000000e-01 : f32
    %7 = vector.broadcast %cst_5 : f32 to vector<16x512xf32>
    %8 = arith.mulf %6, %7 : vector<16x512xf32>
    %cst_6 = arith.constant 5.000000e-01 : f32
    %9 = vector.broadcast %cst_6 : f32 to vector<16x512xf32>
    %10 = arith.addf %8, %9 : vector<16x512xf32>
    %11 = arith.truncf %10 : vector<16x512xf32> to vector<16x512xbf16>
    %c0_7 = arith.constant 0 : index
    %c0_8 = arith.constant 0 : index
    %12 = vector.load %arg4[%c0_7, %c0_8] : memref<512x512xbf16, #tpu.memory_space<vmem>>, vector<512x512xbf16>
    %cst_9 = arith.constant dense<0.000000e+00> : vector<16x512xf32>
    %13 = tpu.matmul %11, %12, %cst_9 {dimension_numbers = #tpu.dot_dimension_numbers<[1], [0], [0], [1], [0, 0, 1, 1], [], []>} : vector<16x512xbf16>, vector<512x512xbf16>, vector<16x512xf32> -> vector<16x512xf32>
    %c0_10 = arith.constant 0 : index
    %c0_11 = arith.constant 0 : index
    %14 = vector.load %arg5[%c0_10, %c0_11] : memref<1x512xf32, #tpu.memory_space<vmem>>, vector<1x512xf32>
    %15 = vector.broadcast %14 : vector<1x512xf32> to vector<16x512xf32>
    %16 = arith.addf %13, %15 : vector<16x512xf32>
    %17 = math.tanh %16 : vector<16x512xf32>
    %cst_12 = arith.constant 5.000000e-01 : f32
    %18 = vector.broadcast %cst_12 : f32 to vector<16x512xf32>
    %19 = arith.mulf %17, %18 : vector<16x512xf32>
    %cst_13 = arith.constant 5.000000e-01 : f32
    %20 = vector.broadcast %cst_13 : f32 to vector<16x512xf32>
    %21 = arith.addf %19, %20 : vector<16x512xf32>
    %22 = arith.truncf %21 : vector<16x512xf32> to vector<16x512xbf16>
    %c0_14 = arith.constant 0 : index
    %c0_15 = arith.constant 0 : index
    %23 = vector.load %arg6[%c0_14, %c0_15] : memref<512x128xbf16, #tpu.memory_space<vmem>>, vector<512x128xbf16>
    %cst_16 = arith.constant dense<0.000000e+00> : vector<16x128xf32>
    %24 = tpu.matmul %22, %23, %cst_16 {dimension_numbers = #tpu.dot_dimension_numbers<[1], [0], [0], [1], [0, 0, 1, 1], [], []>} : vector<16x512xbf16>, vector<512x128xbf16>, vector<16x128xf32> -> vector<16x128xf32>
    %c0_17 = arith.constant 0 : index
    %c0_18 = arith.constant 0 : index
    %25 = vector.load %arg7[%c0_17, %c0_18] : memref<1x128xf32, #tpu.memory_space<vmem>>, vector<1x128xf32>
    %26 = vector.broadcast %25 : vector<1x128xf32> to vector<16x128xf32>
    %27 = arith.addf %24, %26 : vector<16x128xf32>
    %28 = math.tanh %27 : vector<16x128xf32>
    %cst_19 = arith.constant 5.000000e-01 : f32
    %29 = vector.broadcast %cst_19 : f32 to vector<16x128xf32>
    %30 = arith.mulf %28, %29 : vector<16x128xf32>
    %cst_20 = arith.constant 5.000000e-01 : f32
    %31 = vector.broadcast %cst_20 : f32 to vector<16x128xf32>
    %32 = arith.addf %30, %31 : vector<16x128xf32>
    %c0_21 = arith.constant 0 : index
    %c0_22 = arith.constant 0 : index
    %33 = vector.load %arg8[%c0_21, %c0_22] : memref<16x128xf32, #tpu.memory_space<vmem>>, vector<16x128xf32>
    tpu.vector_store %arg8[%c0_21, %c0_22], %32 {strides = array<i32>} : memref<16x128xf32, #tpu.memory_space<vmem>>, vector<16x128xf32>,
    return
  }
  func.func @transform_0(%arg0: i32) -> (i32, i32) {
    %c0_i32 = arith.constant 0 : i32
    %c0_i32_0 = arith.constant 0 : i32
    return %arg0, %c0_i32 : i32, i32
  }
  func.func @transform_1(%arg0: i32) -> (i32, i32) {
    %c0_i32 = arith.constant 0 : i32
    %c0_i32_0 = arith.constant 0 : i32
    %c0_i32_1 = arith.constant 0 : i32
    return %c0_i32, %c0_i32_0 : i32, i32
  }
  func.func @transform_2(%arg0: i32) -> (i32, i32) {
    %c0_i32 = arith.constant 0 : i32
    %c0_i32_0 = arith.constant 0 : i32
    %c0_i32_1 = arith.constant 0 : i32
    return %c0_i32, %c0_i32_0 : i32, i32
  }
  func.func @transform_3(%arg0: i32) -> (i32, i32) {
    %c0_i32 = arith.constant 0 : i32
    %c0_i32_0 = arith.constant 0 : i32
    %c0_i32_1 = arith.constant 0 : i32
    return %c0_i32, %c0_i32_0 : i32, i32
  }
  func.func @transform_4(%arg0: i32) -> (i32, i32) {
    %c0_i32 = arith.constant 0 : i32
    %c0_i32_0 = arith.constant 0 : i32
    %c0_i32_1 = arith.constant 0 : i32
    return %c0_i32, %c0_i32_0 : i32, i32
  }
  func.func @transform_5(%arg0: i32) -> (i32, i32) {
    %c0_i32 = arith.constant 0 : i32
    %c0_i32_0 = arith.constant 0 : i32
    %c0_i32_1 = arith.constant 0 : i32
    return %c0_i32, %c0_i32_0 : i32, i32
  }
  func.func @transform_6(%arg0: i32) -> (i32, i32) {
    %c0_i32 = arith.constant 0 : i32
    %c0_i32_0 = arith.constant 0 : i32
    %c0_i32_1 = arith.constant 0 : i32
    return %c0_i32, %c0_i32_0 : i32, i32
  }
  func.func @transform_7(%arg0: i32) -> (i32, i32) {
    %c0_i32 = arith.constant 0 : i32
    %c0_i32_0 = arith.constant 0 : i32
    return %arg0, %c0_i32 : i32, i32
  }
}

</mosaic_0001>

<bundles_post_ra>
// kernel: mlp_decoder_forward.2
= control target key start
LH: loop header
LB: loop body
LE: loop exit
PB: predicated region body
PF: predicated region fallthrough
CT: control target
= control target key end

     0   :  { %s2528_s0 = inlined_call_operand.hbm [shape: bf16[128,512], index: 0, kind: input, shape index: {}]   ;;  %s2529_s1 = inlined_call_operand.vmem [shape: f32[1,512], index: 1, kind: input, shape index: {}]   ;;  %s2530_s2 = inlined_call_operand.hbm [shape: bf16[512,512], index: 2, kind: input, shape index: {}]   ;;  %s2531_s3 = inlined_call_operand.vmem [shape: f32[1,512], index: 3, kind: input, shape index: {}]   ;;  %s2532_s4 = inlined_call_operand.hbm [shape: bf16[512,128], index: 4, kind: input, shape index: {}]   ;;  %s2533_s5 = inlined_call_operand.vmem [shape: f32[1,128], index: 5, kind: input, shape index: {}]   ;;  %s2534_s6 = inlined_call_operand.vmem [shape: bf16[8,32], index: 6, kind: input, shape index: {}]   ;;  %s2535_s7 = inlined_call_operand.<no memory space> [shape: bf16[], index: 7, kind: input, shape index: {}]   ;;  %s2536_s8 = inlined_call_operand.vmem [shape: f32[16,128], index: 8, kind: output, shape index: {}]  }
   0x1   :  { %v13_v0 = vstv %s2535_s7 }
   0x2   :  { %v2465_v1 = vunpack.i.l.bf16 %v13_v0 }
   0x3   :  { %18 = vsyncpa [#allocation8], 0 }
   0x4   :  { %19 = vsyncpa [#allocation10], 0  ;;  %s2409_s29 = smov [#allocation9]   ;;  %s2410_s9 = smov [#allocation7]  }
   0x5   :  { %s41_s30 = sshll.u32 %s2409_s29, 4  ;;  %s27_s10 = sshll.u32 %s2410_s9, 4  ;;  %s42_s30 = int_to_ptr.vmem [resolvable:$true] %s41_s30  ;;  %s28_s10 = int_to_ptr.vmem [resolvable:$true] %s27_s10 }
   0x6   :  { %s2353_s11 = scalar_lea.vmem %s42_s30, 16384  ;;  %p2358_p1 = scmp.lt.s32.totalorder %s42_s30, %s42_s30 }
   0x7   :  { %p2354_p0 = scmp.ne.s32.totalorder %s42_s30, %s2353_s11  ;;  %p2359_p2 = scmp.lt.s32.totalorder %s2353_s11, %s2353_s11 }
   0x9   :  { %p2360_p3 = por %p2359_p2, %p2358_p1 }
   0xb   :  { %p2361_p4 = pnand %p2360_p3, %p2354_p0 }
   0xd   :  { %2364 = shalt.err (!%p2361_p4)
}
   0xe   :  { %s2411_s12 = smov 256   ;;  %s2412_s13 = smov 16  }
   0xf   :  { %47 = dma.hbm_to_vmem [thread:$0]  %s2530_s2, 16384, %s42_s30, [#allocation10], %s2411_s12, %s2411_s12, %s2412_s13  }
  0x10   :  { %s2373_s15 = scalar_lea.vmem %s28_s10, 4096  ;;  %p2378_p6 = scmp.lt.s32.totalorder %s28_s10, %s28_s10 }
  0x11   :  { %p2374_p5 = scmp.ne.s32.totalorder %s28_s10, %s2373_s15  ;;  %p2379_p7 = scmp.lt.s32.totalorder %s2373_s15, %s2373_s15 }
  0x13   :  { %p2380_p8 = por %p2379_p7, %p2378_p6 }
  0x15   :  { %p2381_p9 = pnand %p2380_p8, %p2374_p5 }
  0x17   :  { %2384 = shalt.err (!%p2381_p9)
}
  0x18   :  { %33 = dma.hbm_to_vmem [thread:$0]  %s2528_s0, 4096, %s28_s10, [#allocation8], %s2411_s12, %s2411_s12, %s2412_s13  }
  0x19   :  { %s2413_s18 = smov [#allocation11]  }
  0x1a   :  { %s55_s19 = sshll.u32 %s2413_s18, 4  ;;  %s56_s19 = int_to_ptr.vmem [resolvable:$true] %s55_s19 }
  0x1b   :  { %s2393_s20 = scalar_lea.vmem %s56_s19, 4096  ;;  %p2398_p11 = scmp.lt.s32.totalorder %s56_s19, %s56_s19 }
  0x1c   :  { %p2394_p10 = scmp.ne.s32.totalorder %s56_s19, %s2393_s20  ;;  %p2399_p12 = scmp.lt.s32.totalorder %s2393_s20, %s2393_s20 }
  0x1e   :  { %p2400_p13 = por %p2399_p12, %p2398_p11 }
  0x20   :  { %p2401_p0 = pnand %p2400_p13, %p2394_p10 }
  0x22   :  { %2404 = shalt.err (!%p2401_p0)
}
  0x23   :  { %s2414_s2 = smov 64   ;;  %s2415_s21 = smov 4  }
  0x24   :  { %61 = dma.hbm_to_vmem [thread:$0]  %s2532_s4, 4096, %s56_s19, [#allocation10], %s2414_s2, %s2414_s2, %s2415_s21  }
  0x25   :  { %2405 = dma.done.wait [#allocation8], 4096  }
  0x26   :  { %2406 = vsyncadd [#allocation8], 4294963200 }
  0x27   :  { %2407 = dma.done.wait [#allocation10], 20480  }
  0x28   :  { %2408 = vsyncadd [#allocation10], 4294946816  ;;  %v2416_v2 = vmov 0   ;;  %v2036_v3 = vld [vmem:[#allocation7 + $0xe4] ss:$16 sps:$4 sm:$0xff]   ;;  %v85_v21 = vlaneseq }
  0x29   :  { %354 = vmatprep.mubr.bf16.mxu0 %v2416_v2  ;;  %397 = vmatprep.mubr.bf16.mxu1 %v2416_v2  ;;  %v2038_v4 = vld [vmem:[#allocation7 + $0xec] ss:$16 sps:$4 sm:$0xff]   ;;  %v2040_v5 = vld [vmem:[#allocation7 + $0xe0] ss:$16 sps:$4 sm:$0xff]   ;;  %v2041_v6 = vld [vmem:[#allocation7 + $0xe8] ss:$16 sps:$4 sm:$0xff]  }
  0x2a   :  { %322 = vmatprep.subr.bf16.mxu0 %v2036_v3  ;;  %365 = vmatprep.subr.bf16.mxu1 %v2038_v4  ;;  %v2042_v7 = vld [vmem:[#allocation7 + $0xc4] ss:$16 sps:$4 sm:$0xff]   ;;  %v2044_v8 = vld [vmem:[#allocation7 + $0xcc] ss:$16 sps:$4 sm:$0xff]   ;;  %v2046_v9 = vld [vmem:[#allocation7 + $0xc0] ss:$16 sps:$4 sm:$0xff]  }
  0x2b   :  { %323 = vmatpush1.bf16.msra.mxu0 %v2040_v5  ;;  %366 = vmatpush1.bf16.msra.mxu1 %v2041_v6  ;;  %v2047_v10 = vld [vmem:[#allocation7 + $0xc8] ss:$16 sps:$4 sm:$0xff]   ;;  %v2048_v11 = vld [vmem:[#allocation7 + $0xa4] ss:$16 sps:$4 sm:$0xff]   ;;  %v2050_v12 = vld [vmem:[#allocation7 + $0xac] ss:$16 sps:$4 sm:$0xff]  }
  0x2c   :  { %324 = vmatprep.subr.bf16.mxu0 %v2042_v7  ;;  %367 = vmatprep.subr.bf16.mxu1 %v2044_v8  ;;  %v2052_v13 = vld [vmem:[#allocation7 + $0xa0] ss:$16 sps:$4 sm:$0xff]   ;;  %v2053_v14 = vld [vmem:[#allocation7 + $0xa8] ss:$16 sps:$4 sm:$0xff]   ;;  %v2054_v15 = vld [vmem:[#allocation7 + $0x84] ss:$16 sps:$4 sm:$0xff]  }
  0x2d   :  { %v2056_v16 = vld [vmem:[#allocation7 + $0x8c] ss:$16 sps:$4 sm:$0xff]   ;;  %v2058_v17 = vld [vmem:[#allocation7 + $0x80] ss:$16 sps:$4 sm:$0xff]   ;;  %v2059_v18 = vld [vmem:[#allocation7 + $0x88] ss:$16 sps:$4 sm:$0xff]  }
  0x2e   :  { %v2060_v19 = vld [vmem:[#allocation7 + $0x64] ss:$16 sps:$4 sm:$0xff]   ;;  %v2062_v20 = vld [vmem:[#allocation7 + $0x6c] ss:$16 sps:$4 sm:$0xff]   ;;  %v2064_v22 = vld [vmem:[#allocation7 + $0x60] ss:$16 sps:$4 sm:$0xff]  }
  0x2f   :  { %325 = vmatpush1.bf16.msra.mxu0 %v2046_v9  ;;  %368 = vmatpush1.bf16.msra.mxu1 %v2047_v10  ;;  %v2065_v23 = vld [vmem:[#allocation7 + $0x68] ss:$16 sps:$4 sm:$0xff]   ;;  %v2066_v24 = vld [vmem:[#allocation7 + $0x44] ss:$16 sps:$4 sm:$0xff]   ;;  %v2068_v25 = vld [vmem:[#allocation7 + $0x4c] ss:$16 sps:$4 sm:$0xff]  }
  0x30   :  { %326 = vmatprep.subr.bf16.mxu0 %v2048_v11  ;;  %369 = vmatprep.subr.bf16.mxu1 %v2050_v12  ;;  %v86_v26 = vand.u32 127, %v85_v21  ;;  %v2070_v27 = vld [vmem:[#allocation7 + $0x40] ss:$16 sps:$4 sm:$0xff]   ;;  %v2071_v28 = vld [vmem:[#allocation7 + $0x48] ss:$16 sps:$4 sm:$0xff]  }
  0x31   :  { %v2072_v29 = vld [vmem:[#allocation7 + $0x24] ss:$16 sps:$4 sm:$0xff]   ;;  %v2074_v30 = vld [vmem:[#allocation7 + $0x2c] ss:$16 sps:$4 sm:$0xff]   ;;  %v82_v31 = vld [vmem:[%s2534_s6] sm:$0xf] }
  0x32   :  { %vm88_vm0 = vcmp.lt.s32.totalorder %v86_v26, 32  ;;  %v83_v32 = vunpack.c.l.bf16 %v82_v31  ;;  %v2076_v33 = vld [vmem:[#allocation7 + $0x20] ss:$16 sps:$4 sm:$0xff]   ;;  %v2077_v34 = vld [vmem:[#allocation7 + $0x28] ss:$16 sps:$4 sm:$0xff]  }
  0x33   :  { %327 = vmatpush1.bf16.msra.mxu0 %v2052_v13  ;;  %370 = vmatpush1.bf16.msra.mxu1 %v2053_v14  ;;  %v2078_v36 = vld [vmem:[#allocation7 + $0x4] ss:$16 sps:$4 sm:$0xff]   ;;  %v2080_v37 = vld [vmem:[#allocation7 + $0xc] ss:$16 sps:$4 sm:$0xff]   ;;  %v2082_v39 = vld [vmem:[#allocation7] ss:$16 sps:$4 sm:$0xff]  }
  0x34   :  { %328 = vmatprep.subr.bf16.mxu0 %v2054_v15  ;;  %371 = vmatprep.subr.bf16.mxu1 %v2056_v16  ;;  %v89_v35 = vsel %vm88_vm0, %v83_v32, %v2465_v1  ;;  %v2083_v40 = vld [vmem:[#allocation7 + $0x8] ss:$16 sps:$4 sm:$0xff]   ;;  %v2087_v41 = vld [vmem:[#allocation9 + $0xe4] ss:$16 sps:$4 sm:$0xff]   ;;  %v2085_v43 = vld [vmem:[#allocation9 + $0xe0] ss:$16 sps:$4 sm:$0xff]  }
  0x35   :  { %v1982_v38 = vpack.c.bf16 %v2465_v1, %v89_v35  ;;  %v2090_v42 = vld [vmem:[#allocation9 + $0x2e4] ss:$16 sps:$4 sm:$0xff]   ;;  %v2088_v44 = vld [vmem:[#allocation9 + $0x2e0] ss:$16 sps:$4 sm:$0xff]  }
  0x36   :  { %v2093_v45 = vld [vmem:[#allocation9 + $0xc4] ss:$16 sps:$4 sm:$0xff]   ;;  %v2091_v48 = vld [vmem:[#allocation9 + $0xc0] ss:$16 sps:$4 sm:$0xff]  }
  0x37   :  { %329 = vmatpush1.bf16.msra.mxu0 %v2058_v17  ;;  %372 = vmatpush1.bf16.msra.mxu1 %v2059_v18  ;;  %1983 = vst [vmem:[#allocation12] sm:$0xff] %v1982_v38   ;;  %v2096_v46 = vld [vmem:[#allocation9 + $0x2c4] ss:$16 sps:$4 sm:$0xff]   ;;  %v2094_v49 = vld [vmem:[#allocation9 + $0x2c0] ss:$16 sps:$4 sm:$0xff]  }
  0x38   :  { %330 = vmatprep.subr.bf16.mxu0 %v2060_v19  ;;  %373 = vmatprep.subr.bf16.mxu1 %v2062_v20  ;;  %v2099_v50 = vld [vmem:[#allocation9 + $0xa4] ss:$16 sps:$4 sm:$0xff]   ;;  %v2097_v52 = vld [vmem:[#allocation9 + $0xa0] ss:$16 sps:$4 sm:$0xff]  }
  0x39   :  { %v2102_v51 = vld [vmem:[#allocation9 + $0x2a4] ss:$16 sps:$4 sm:$0xff]   ;;  %v2100_v53 = vld [vmem:[#allocation9 + $0x2a0] ss:$16 sps:$4 sm:$0xff]  }
  0x3a   :  { %v2105_v54 = vld [vmem:[#allocation9 + $0x84] ss:$16 sps:$4 sm:$0xff]   ;;  %v2103_v56 = vld [vmem:[#allocation9 + $0x80] ss:$16 sps:$4 sm:$0xff]  }
  0x3b   :  { %331 = vmatpush1.bf16.msra.mxu0 %v2064_v22  ;;  %374 = vmatpush1.bf16.msra.mxu1 %v2065_v23  ;;  %v2108_v55 = vld [vmem:[#allocation9 + $0x284] ss:$16 sps:$4 sm:$0xff]   ;;  %v2106_v57 = vld [vmem:[#allocation9 + $0x280] ss:$16 sps:$4 sm:$0xff]  }
  0x3c   :  { %332 = vmatprep.subr.bf16.mxu0 %v2066_v24  ;;  %375 = vmatprep.subr.bf16.mxu1 %v2068_v25  ;;  %v2111_v58 = vld [vmem:[#allocation9 + $0x64] ss:$16 sps:$4 sm:$0xff]   ;;  %v2109_v60 = vld [vmem:[#allocation9 + $0x60] ss:$16 sps:$4 sm:$0xff]  }
  0x3d   :  { %v2114_v59 = vld [vmem:[#allocation9 + $0x264] ss:$16 sps:$4 sm:$0xff]   ;;  %v2112_v61 = vld [vmem:[#allocation9 + $0x260] ss:$16 sps:$4 sm:$0xff]  }
  0x3e   :  { %v2084_v47 = vld [vmem:[#allocation12] sm:$0xff]  }
  0x3f   :  { %333 = vmatpush1.bf16.msra.mxu0 %v2070_v27  ;;  %376 = vmatpush1.bf16.msra.mxu1 %v2071_v28  ;;  %v2117_v62 = vld [vmem:[#allocation9 + $0x44] ss:$16 sps:$4 sm:$0xff]   ;;  %v2115_v0 = vld [vmem:[#allocation9 + $0x40] ss:$16 sps:$4 sm:$0xff]  }
  0x40   :  { %334 = vmatprep.subr.bf16.mxu0 %v2072_v29  ;;  %377 = vmatprep.subr.bf16.mxu1 %v2074_v30  ;;  %v2120_v63 = vld [vmem:[#allocation9 + $0x244] ss:$16 sps:$4 sm:$0xff]   ;;  %v2118_v1 = vld [vmem:[#allocation9 + $0x240] ss:$16 sps:$4 sm:$0xff]  }
  0x41   :  { %v2123_v2 = vld [vmem:[#allocation9 + $0x24] ss:$16 sps:$4 sm:$0xff]   ;;  %v2121_v4 = vld [vmem:[#allocation9 + $0x20] ss:$16 sps:$4 sm:$0xff]  }
  0x42   :  { %v2126_v3 = vld [vmem:[#allocation9 + $0x224] ss:$16 sps:$4 sm:$0xff]   ;;  %v2124_v5 = vld [vmem:[#allocation9 + $0x220] ss:$16 sps:$4 sm:$0xff]  }
  0x43   :  { %335 = vmatpush1.bf16.msra.mxu0 %v2076_v33  ;;  %378 = vmatpush1.bf16.msra.mxu1 %v2077_v34  ;;  %v2129_v6 = vld [vmem:[#allocation9 + $0x4] ss:$16 sps:$4 sm:$0xff]   ;;  %v2127_v8 = vld [vmem:[#allocation9] ss:$16 sps:$4 sm:$0xff]  }
  0x44   :  { %336 = vmatprep.subr.bf16.mxu0 %v2078_v36  ;;  %379 = vmatprep.subr.bf16.mxu1 %v2080_v37  ;;  %v2132_v7 = vld [vmem:[#allocation9 + $0x204] ss:$16 sps:$4 sm:$0xff]   ;;  %v2130_v9 = vld [vmem:[#allocation9 + $0x200] ss:$16 sps:$4 sm:$0xff]  }
  0x45   :  { %v2135_v10 = vld [vmem:[#allocation9 + $0x1e4] ss:$16 sps:$4 sm:$0xff]   ;;  %v2133_v12 = vld [vmem:[#allocation9 + $0x1e0] ss:$16 sps:$4 sm:$0xff]  }
  0x46   :  { %v2138_v11 = vld [vmem:[#allocation9 + $0x3e4] ss:$16 sps:$4 sm:$0xff]   ;;  %v2136_v13 = vld [vmem:[#allocation9 + $0x3e0] ss:$16 sps:$4 sm:$0xff]  }
  0x47   :  { %337 = vmatpush1.bf16.msra.mxu0 %v2082_v39  ;;  %380 = vmatpush1.bf16.msra.mxu1 %v2083_v40  ;;  %v2141_v14 = vld [vmem:[#allocation9 + $0x1c4] ss:$16 sps:$4 sm:$0xff]   ;;  %v2139_v16 = vld [vmem:[#allocation9 + $0x1c0] ss:$16 sps:$4 sm:$0xff]  }
  0x48   :  { %1226 = vmatprep.subr.bf16.mxu0 %v2087_v41  ;;  %1269 = vmatprep.subr.bf16.mxu1 %v2090_v42  ;;  %v2144_v15 = vld [vmem:[#allocation9 + $0x3c4] ss:$16 sps:$4 sm:$0xff]   ;;  %v2142_v17 = vld [vmem:[#allocation9 + $0x3c0] ss:$16 sps:$4 sm:$0xff]  }
  0x49   :  { %v2147_v18 = vld [vmem:[#allocation9 + $0x1a4] ss:$16 sps:$4 sm:$0xff]   ;;  %v2145_v20 = vld [vmem:[#allocation9 + $0x1a0] ss:$16 sps:$4 sm:$0xff]  }
  0x4a   :  { %355 = vmatmul.mubr.bf16.vlgmr.msra.gmra.mxu0 %v2084_v47  ;;  %398 = vmatmul.mubr.bf16.vlgmr.msra.gmra.mxu1 %v2084_v47  ;;  %v2150_v19 = vld [vmem:[#allocation9 + $0x3a4] ss:$16 sps:$4 sm:$0xff]   ;;  %v2148_v22 = vld [vmem:[#allocation9 + $0x3a0] ss:$16 sps:$4 sm:$0xff]  }
  0x4b   :  { %1227 = vmatpush1.bf16.msra.mxu0 %v2085_v43  ;;  %1270 = vmatpush1.bf16.msra.mxu1 %v2088_v44  ;;  %v2153_v23 = vld [vmem:[#allocation9 + $0x184] ss:$16 sps:$4 sm:$0xff]   ;;  %v2151_v25 = vld [vmem:[#allocation9 + $0x180] ss:$16 sps:$4 sm:$0xff]   ;;  %v2183_v43 = vld [vmem:[#allocation9 + $0xec] ss:$16 sps:$4 sm:$0xff]  }
  0x4c   :  { %1228 = vmatprep.subr.bf16.mxu0 %v2093_v45  ;;  %1271 = vmatprep.subr.bf16.mxu1 %v2096_v46  ;;  %v2156_v24 = vld [vmem:[#allocation9 + $0x384] ss:$16 sps:$4 sm:$0xff]   ;;  %v2154_v26 = vld [vmem:[#allocation9 + $0x380] ss:$16 sps:$4 sm:$0xff]   ;;  %v2186_v44 = vld [vmem:[#allocation9 + $0x2ec] ss:$16 sps:$4 sm:$0xff]  }
  0x4d   :  { %v2159_v27 = vld [vmem:[#allocation9 + $0x164] ss:$16 sps:$4 sm:$0xff]   ;;  %v2157_v29 = vld [vmem:[#allocation9 + $0x160] ss:$16 sps:$4 sm:$0xff]   ;;  %v2483_v45 = vshrl.u32 %v85_v21, 7 }
  0x4e   :  { %v2162_v28 = vld [vmem:[#allocation9 + $0x364] ss:$16 sps:$4 sm:$0xff]   ;;  %v2160_v30 = vld [vmem:[#allocation9 + $0x360] ss:$16 sps:$4 sm:$0xff]  }
  0x4f   :  { %1229 = vmatpush1.bf16.msra.mxu0 %v2091_v48  ;;  %1272 = vmatpush1.bf16.msra.mxu1 %v2094_v49  ;;  %v2165_v31 = vld [vmem:[#allocation9 + $0x144] ss:$16 sps:$4 sm:$0xff]   ;;  %v2163_v33 = vld [vmem:[#allocation9 + $0x140] ss:$16 sps:$4 sm:$0xff]   ;;  %v138_v46 = vsub.s32 0, %v2483_v45  ;;  %v146_v47 = vsub.s32 2, %v2483_v45 }
  0x50   :  { %1230 = vmatprep.subr.bf16.mxu0 %v2099_v50  ;;  %1273 = vmatprep.subr.bf16.mxu1 %v2102_v51  ;;  %v2168_v32 = vld [vmem:[#allocation9 + $0x344] ss:$16 sps:$4 sm:$0xff]   ;;  %v2166_v34 = vld [vmem:[#allocation9 + $0x340] ss:$16 sps:$4 sm:$0xff]   ;;  %v142_v49 = vsub.s32 1, %v2483_v45  ;;  %v150_v50 = vsub.s32 3, %v2483_v45 }
  0x51   :  { %v2171_v35 = vld [vmem:[#allocation9 + $0x124] ss:$16 sps:$4 sm:$0xff]   ;;  %v2169_v37 = vld [vmem:[#allocation9 + $0x120] ss:$16 sps:$4 sm:$0xff]  }
  0x52   :  { %v2174_v36 = vld [vmem:[#allocation9 + $0x324] ss:$16 sps:$4 sm:$0xff]   ;;  %v2172_v38 = vld [vmem:[#allocation9 + $0x320] ss:$16 sps:$4 sm:$0xff]  }
  0x53   :  { %1231 = vmatpush1.bf16.msra.mxu0 %v2097_v52  ;;  %1274 = vmatpush1.bf16.msra.mxu1 %v2100_v53  ;;  %v2177_v39 = vld [vmem:[#allocation9 + $0x104] ss:$16 sps:$4 sm:$0xff]   ;;  %v2175_v41 = vld [vmem:[#allocation9 + $0x100] ss:$16 sps:$4 sm:$0xff]  }
  0x54   :  { %1232 = vmatprep.subr.bf16.mxu0 %v2105_v54  ;;  %1275 = vmatprep.subr.bf16.mxu1 %v2108_v55  ;;  %v2180_v40 = vld [vmem:[#allocation9 + $0x304] ss:$16 sps:$4 sm:$0xff]   ;;  %v2178_v42 = vld [vmem:[#allocation9 + $0x300] ss:$16 sps:$4 sm:$0xff]  }
  0x55   :  { %v134_v48 = vld [vmem:[%s2529_s1] sm:$0xf] }
  0x56   :  { %v139_v51 = vrot.slane %v134_v48, %v138_v46  ;;  %v147_v52 = vrot.slane %v134_v48, %v146_v47  ;;  %v143_v21 = vrot.slane %v134_v48, %v142_v49  ;;  %v151_v53 = vrot.slane %v134_v48, %v150_v50  ;;  %v2201_v48 = vld [vmem:[#allocation9 + $0x8c] ss:$16 sps:$4 sm:$0xff]  }
  0x57   :  { %1233 = vmatpush1.bf16.msra.mxu0 %v2103_v56  ;;  %1276 = vmatpush1.bf16.msra.mxu1 %v2106_v57 }
  0x58   :  { %1234 = vmatprep.subr.bf16.mxu0 %v2111_v58  ;;  %1277 = vmatprep.subr.bf16.mxu1 %v2114_v59 }
  0x5b   :  { %1235 = vmatpush1.bf16.msra.mxu0 %v2109_v60  ;;  %1278 = vmatpush1.bf16.msra.mxu1 %v2112_v61 }
  0x5c   :  { %1236 = vmatprep.subr.bf16.mxu0 %v2117_v62  ;;  %1279 = vmatprep.subr.bf16.mxu1 %v2120_v63 }
  0x5f   :  { %1237 = vmatpush1.bf16.msra.mxu0 %v2115_v0  ;;  %1280 = vmatpush1.bf16.msra.mxu1 %v2118_v1 }
  0x60   :  { %1238 = vmatprep.subr.bf16.mxu0 %v2123_v2  ;;  %1281 = vmatprep.subr.bf16.mxu1 %v2126_v3 }
  0x63   :  { %1239 = vmatpush1.bf16.msra.mxu0 %v2121_v4  ;;  %1282 = vmatpush1.bf16.msra.mxu1 %v2124_v5 }
  0x64   :  { %1240 = vmatprep.subr.bf16.mxu0 %v2129_v6  ;;  %1283 = vmatprep.subr.bf16.mxu1 %v2132_v7 }
  0x67   :  { %1241 = vmatpush1.bf16.msra.mxu0 %v2127_v8  ;;  %1284 = vmatpush1.bf16.msra.mxu1 %v2130_v9 }
  0x68   :  { %1242 = vmatprep.subr.bf16.mxu0 %v2135_v10  ;;  %1285 = vmatprep.subr.bf16.mxu1 %v2138_v11 }
  0x6b   :  { %1243 = vmatpush2.bf16.msra.mxu0 %v2133_v12  ;;  %1286 = vmatpush2.bf16.msra.mxu1 %v2136_v13 }
  0x6c   :  { %1244 = vmatprep.subr.bf16.mxu0 %v2141_v14  ;;  %1287 = vmatprep.subr.bf16.mxu1 %v2144_v15 }
  0x6f   :  { %1245 = vmatpush2.bf16.msra.mxu0 %v2139_v16  ;;  %1288 = vmatpush2.bf16.msra.mxu1 %v2142_v17 }
  0x70   :  { %1246 = vmatprep.subr.bf16.mxu0 %v2147_v18  ;;  %1289 = vmatprep.subr.bf16.mxu1 %v2150_v19 }
  0x73   :  { %1247 = vmatpush2.bf16.msra.mxu0 %v2145_v20  ;;  %1290 = vmatpush2.bf16.msra.mxu1 %v2148_v22 }
  0x74   :  { %1248 = vmatprep.subr.bf16.mxu0 %v2153_v23  ;;  %1291 = vmatprep.subr.bf16.mxu1 %v2156_v24 }
  0x77   :  { %1249 = vmatpush2.bf16.msra.mxu0 %v2151_v25  ;;  %1292 = vmatpush2.bf16.msra.mxu1 %v2154_v26 }
  0x78   :  { %1250 = vmatprep.subr.bf16.mxu0 %v2159_v27  ;;  %1293 = vmatprep.subr.bf16.mxu1 %v2162_v28 }
  0x7b   :  { %1251 = vmatpush2.bf16.msra.mxu0 %v2157_v29  ;;  %1294 = vmatpush2.bf16.msra.mxu1 %v2160_v30 }
  0x7c   :  { %1252 = vmatprep.subr.bf16.mxu0 %v2165_v31  ;;  %1295 = vmatprep.subr.bf16.mxu1 %v2168_v32  ;;  %v2181_v32 = vld [vmem:[#allocation9 + $0xe8] ss:$16 sps:$4 sm:$0xff]  }
  0x7f   :  { %1253 = vmatpush2.bf16.msra.mxu0 %v2163_v33  ;;  %1296 = vmatpush2.bf16.msra.mxu1 %v2166_v34 }
  0x80   :  { %1254 = vmatprep.subr.bf16.mxu0 %v2171_v35  ;;  %1297 = vmatprep.subr.bf16.mxu1 %v2174_v36  ;;  %v2184_v35 = vld [vmem:[#allocation9 + $0x2e8] ss:$16 sps:$4 sm:$0xff]  }
  0x83   :  { %1255 = vmatpush2.bf16.msra.mxu0 %v2169_v37  ;;  %1298 = vmatpush2.bf16.msra.mxu1 %v2172_v38  ;;  %v2189_v37 = vld [vmem:[#allocation9 + $0xcc] ss:$16 sps:$4 sm:$0xff]  }
  0x84   :  { %1256 = vmatprep.subr.bf16.mxu0 %v2177_v39  ;;  %1299 = vmatprep.subr.bf16.mxu1 %v2180_v40  ;;  %v2192_v38 = vld [vmem:[#allocation9 + $0x2cc] ss:$16 sps:$4 sm:$0xff]   ;;  %v2187_v39 = vld [vmem:[#allocation9 + $0xc8] ss:$16 sps:$4 sm:$0xff]  }
  0x85   :  { %v2190_v40 = vld [vmem:[#allocation9 + $0x2c8] ss:$16 sps:$4 sm:$0xff]  }
  0x87   :  { %1257 = vmatpush2.bf16.msra.mxu0 %v2175_v41  ;;  %1300 = vmatpush2.bf16.msra.mxu1 %v2178_v42  ;;  %v2195_v41 = vld [vmem:[#allocation9 + $0xac] ss:$16 sps:$4 sm:$0xff]  }
  0x88   :  { %1312 = vmatprep.subr.bf16.mxu0 %v2183_v43  ;;  %1355 = vmatprep.subr.bf16.mxu1 %v2186_v44  ;;  %v2198_v42 = vld [vmem:[#allocation9 + $0x2ac] ss:$16 sps:$4 sm:$0xff]   ;;  %v2193_v43 = vld [vmem:[#allocation9 + $0xa8] ss:$16 sps:$4 sm:$0xff]  }
  0x89   :  { %v2196_v44 = vld [vmem:[#allocation9 + $0x2a8] ss:$16 sps:$4 sm:$0xff]  }
 0x10a   :  { %v356_v54 = vpop.f32.mrf.mxu0  ;;  %v399_v55 = vpop.f32.mrf.mxu1 }
 0x10b   :  { %v357_v56 = vadd.f32 %v356_v54, %v139_v51  ;;  %v400_v57 = vadd.f32 %v399_v55, %v147_v52  ;;  %v2210_v54 = vld [vmem:[#allocation9 + $0x26c] ss:$16 sps:$4 sm:$0xff]   ;;  %v2205_v55 = vld [vmem:[#allocation9 + $0x68] ss:$16 sps:$4 sm:$0xff]  }
 0x10c   :  { %v358_v58 = vpop.f32.mrf.mxu0  ;;  %v401_v59 = vpop.f32.mrf.mxu1 }
 0x10d   :  { %2309 = vtanh.f32 %v357_v56  ;;  %v359_v60 = vadd.f32 %v358_v58, %v143_v21  ;;  %v402_v61 = vadd.f32 %v401_v59, %v151_v53  ;;  %v2208_v56 = vld [vmem:[#allocation9 + $0x268] ss:$16 sps:$4 sm:$0xff]   ;;  %v2216_v58 = vld [vmem:[#allocation9 + $0x24c] ss:$16 sps:$4 sm:$0xff]  }
 0x10e   :  { %2311 = vtanh.f32 %v400_v57  ;;  %v360_v62 = vpop.f32.mrf.mxu0  ;;  %v403_v63 = vpop.f32.mrf.mxu1  ;;  %v2213_v57 = vld [vmem:[#allocation9 + $0x4c] ss:$16 sps:$4 sm:$0xff]   ;;  %v2211_v59 = vld [vmem:[#allocation9 + $0x48] ss:$16 sps:$4 sm:$0xff]  }
 0x10f   :  { %2313 = vtanh.f32 %v359_v60  ;;  %v361_v0 = vadd.f32 %v360_v62, %v139_v51  ;;  %v404_v1 = vadd.f32 %v403_v63, %v147_v52  ;;  %v2204_v51 = vld [vmem:[#allocation9 + $0x28c] ss:$16 sps:$4 sm:$0xff]   ;;  %v2199_v52 = vld [vmem:[#allocation9 + $0x88] ss:$16 sps:$4 sm:$0xff]  }
 0x110   :  { %2315 = vtanh.f32 %v402_v61  ;;  %v362_v2 = vpop.f32.mrf.mxu0  ;;  %v405_v3 = vpop.f32.mrf.mxu1  ;;  %v2214_v60 = vld [vmem:[#allocation9 + $0x248] ss:$16 sps:$4 sm:$0xff]   ;;  %v2219_v61 = vld [vmem:[#allocation9 + $0x2c] ss:$16 sps:$4 sm:$0xff]  }
 0x111   :  { %2317 = vtanh.f32 %v361_v0  ;;  %v363_v4 = vadd.f32 %v362_v2, %v143_v21  ;;  %v406_v5 = vadd.f32 %v405_v3, %v151_v53  ;;  %v2202_v21 = vld [vmem:[#allocation9 + $0x288] ss:$16 sps:$4 sm:$0xff]   ;;  %v2207_v53 = vld [vmem:[#allocation9 + $0x6c] ss:$16 sps:$4 sm:$0xff]  }
 0x112   :  { %2319 = vtanh.f32 %v404_v1  ;;  %v2222_v62 = vld [vmem:[#allocation9 + $0x22c] ss:$16 sps:$4 sm:$0xff]   ;;  %v2217_v63 = vld [vmem:[#allocation9 + $0x28] ss:$16 sps:$4 sm:$0xff]  }
 0x113   :  { %2321 = vtanh.f32 %v363_v4  ;;  %v2220_v0 = vld [vmem:[#allocation9 + $0x228] ss:$16 sps:$4 sm:$0xff]   ;;  %v2225_v1 = vld [vmem:[#allocation9 + $0xc] ss:$16 sps:$4 sm:$0xff]  }
 0x114   :  { %2323 = vtanh.f32 %v406_v5  ;;  %v2228_v2 = vld [vmem:[#allocation9 + $0x20c] ss:$16 sps:$4 sm:$0xff]   ;;  %v2223_v3 = vld [vmem:[#allocation9 + $0x8] ss:$16 sps:$4 sm:$0xff]  }
 0x115   :  { %v2226_v4 = vld [vmem:[#allocation9 + $0x208] ss:$16 sps:$4 sm:$0xff]   ;;  %v2231_v5 = vld [vmem:[#allocation9 + $0x1ec] ss:$16 sps:$4 sm:$0xff]  }
 0x11a   :  { %v2310_v6 = vpop.eup %2309 }
 0x11b   :  { %v2312_v7 = vpop.eup %2311  ;;  %v416_v15 = vmul.f32 0.5, %v2310_v6  ;;  %v2234_v6 = vld [vmem:[#allocation9 + $0x3ec] ss:$16 sps:$4 sm:$0xff]  }
 0x11c   :  { %v2314_v8 = vpop.eup %2313  ;;  %v418_v19 = vmul.f32 0.5, %v2312_v7  ;;  %v2229_v7 = vld [vmem:[#allocation9 + $0x1e8] ss:$16 sps:$4 sm:$0xff]  }
 0x11d   :  { %v2316_v9 = vpop.eup %2315  ;;  %v417_v12 = vmul.f32 0.5, %v2314_v8  ;;  %v424_v27 = vadd.f32 0.5, %v416_v15  ;;  %v2232_v8 = vld [vmem:[#allocation9 + $0x3e8] ss:$16 sps:$4 sm:$0xff]  }
 0x11e   :  { %v2318_v10 = vpop.eup %2317  ;;  %v419_v16 = vmul.f32 0.5, %v2316_v9  ;;  %v426_v30 = vadd.f32 0.5, %v418_v19  ;;  %v2237_v9 = vld [vmem:[#allocation9 + $0x1cc] ss:$16 sps:$4 sm:$0xff]   ;;  %v2241_v15 = vld [vmem:[#allocation9 + $0x1a8] ss:$16 sps:$4 sm:$0xff]  }
 0x11f   :  { %v2320_v11 = vpop.eup %2319  ;;  %v420_v13 = vmul.f32 0.5, %v2318_v10  ;;  %v425_v24 = vadd.f32 0.5, %v417_v12  ;;  %v2240_v10 = vld [vmem:[#allocation9 + $0x3cc] ss:$16 sps:$4 sm:$0xff]   ;;  %v2238_v12 = vld [vmem:[#allocation9 + $0x3c8] ss:$16 sps:$4 sm:$0xff]  }
 0x120   :  { %v2322_v14 = vpop.eup %2321  ;;  %v422_v17 = vmul.f32 0.5, %v2320_v11  ;;  %v427_v28 = vadd.f32 0.5, %v419_v16  ;;  %v2235_v11 = vld [vmem:[#allocation9 + $0x1c8] ss:$16 sps:$4 sm:$0xff]  }
 0x121   :  { %v2324_v18 = vpop.eup %2323  ;;  %v421_v20 = vmul.f32 0.5, %v2322_v14  ;;  %v428_v22 = vadd.f32 0.5, %v420_v13  ;;  %v2243_v13 = vld [vmem:[#allocation9 + $0x1ac] ss:$16 sps:$4 sm:$0xff]   ;;  %v2244_v16 = vld [vmem:[#allocation9 + $0x3a8] ss:$16 sps:$4 sm:$0xff]  }
 0x122   :  { %v423_v23 = vmul.f32 0.5, %v2324_v18  ;;  %v430_v25 = vadd.f32 0.5, %v422_v17  ;;  %v2246_v14 = vld [vmem:[#allocation9 + $0x3ac] ss:$16 sps:$4 sm:$0xff]   ;;  %v2247_v19 = vld [vmem:[#allocation9 + $0x188] ss:$16 sps:$4 sm:$0xff]  }
 0x123   :  { %v429_v26 = vadd.f32 0.5, %v421_v20  ;;  %v2500_v33 = vpack.c.bf16 %v428_v22, %v424_v27  ;;  %v2249_v17 = vld [vmem:[#allocation9 + $0x18c] ss:$16 sps:$4 sm:$0xff]   ;;  %v2250_v20 = vld [vmem:[#allocation9 + $0x388] ss:$16 sps:$4 sm:$0xff]  }
 0x124   :  { %v431_v29 = vadd.f32 0.5, %v423_v23  ;;  %v2502_v36 = vpack.c.bf16 %v430_v25, %v426_v30  ;;  %v2252_v18 = vld [vmem:[#allocation9 + $0x38c] ss:$16 sps:$4 sm:$0xff]   ;;  %v2256_v25 = vld [vmem:[#allocation9 + $0x368] ss:$16 sps:$4 sm:$0xff]  }
 0x125   :  { %v433_v31 = vpack.c.bf16 %v429_v26, %v425_v24  ;;  %v2255_v22 = vld [vmem:[#allocation9 + $0x16c] ss:$16 sps:$4 sm:$0xff]   ;;  %v2253_v24 = vld [vmem:[#allocation9 + $0x168] ss:$16 sps:$4 sm:$0xff]  }
 0x126   :  { %v435_v34 = vpack.c.bf16 %v431_v29, %v427_v28  ;;  %v2258_v23 = vld [vmem:[#allocation9 + $0x36c] ss:$16 sps:$4 sm:$0xff]   ;;  %v2259_v28 = vld [vmem:[#allocation9 + $0x148] ss:$16 sps:$4 sm:$0xff]  }
 0x127   :  { %1258 = vmatprep.mubr.bf16.mxu0 %v433_v31  ;;  %v2261_v26 = vld [vmem:[#allocation9 + $0x14c] ss:$16 sps:$4 sm:$0xff]   ;;  %v2262_v29 = vld [vmem:[#allocation9 + $0x348] ss:$16 sps:$4 sm:$0xff]  }
 0x128   :  { %1301 = vmatprep.mubr.bf16.mxu1 %v435_v34  ;;  %1259 = vmatmul.mubr.bf16.vlgmr.msra.gmra.mxu0 %v2500_v33  ;;  %v2264_v27 = vld [vmem:[#allocation9 + $0x34c] ss:$16 sps:$4 sm:$0xff]  }
 0x129   :  { %1302 = vmatmul.mubr.bf16.vlgmr.msra.gmra.mxu1 %v2502_v36  ;;  %1313 = vmatpush1.bf16.msra.mxu0 %v2181_v32  ;;  %v2267_v30 = vld [vmem:[#allocation9 + $0x12c] ss:$16 sps:$4 sm:$0xff]   ;;  %v2265_v32 = vld [vmem:[#allocation9 + $0x128] ss:$16 sps:$4 sm:$0xff]  }
 0x12a   :  { %1356 = vmatpush1.bf16.msra.mxu1 %v2184_v35  ;;  %1344 = vmatprep.mubr.bf16.mxu0 %v433_v31  ;;  %v2270_v31 = vld [vmem:[#allocation9 + $0x32c] ss:$16 sps:$4 sm:$0xff]  }
 0x12b   :  { %1387 = vmatprep.mubr.bf16.mxu1 %v435_v34  ;;  %1314 = vmatprep.subr.bf16.mxu0 %v2189_v37  ;;  %v2268_v34 = vld [vmem:[#allocation9 + $0x328] ss:$16 sps:$4 sm:$0xff]   ;;  %v2273_v35 = vld [vmem:[#allocation9 + $0x10c] ss:$16 sps:$4 sm:$0xff]  }
 0x12c   :  { %1357 = vmatprep.subr.bf16.mxu1 %v2192_v38  ;;  %v2276_v37 = vld [vmem:[#allocation9 + $0x30c] ss:$16 sps:$4 sm:$0xff]   ;;  %v2271_v38 = vld [vmem:[#allocation9 + $0x108] ss:$16 sps:$4 sm:$0xff]  }
 0x12d   :  { %1315 = vmatpush1.bf16.msra.mxu0 %v2187_v39  ;;  %v2274_v39 = vld [vmem:[#allocation9 + $0x308] ss:$16 sps:$4 sm:$0xff]  }
 0x12e   :  { %1358 = vmatpush1.bf16.msra.mxu1 %v2190_v40  ;;  %1316 = vmatprep.subr.bf16.mxu0 %v2195_v41  ;;  %v2277_v40 = vld [vmem:[#allocation11 + $0x78] sm:$0xff]  }
 0x12f   :  { %1359 = vmatprep.subr.bf16.mxu1 %v2198_v42  ;;  %v2278_v41 = vld [vmem:[#allocation11 + $0x38] sm:$0xff]   ;;  %v2279_v42 = vld [vmem:[#allocation11 + $0x70] sm:$0xff]  }
 0x131   :  { %1317 = vmatpush1.bf16.msra.mxu0 %v2193_v43  ;;  %v2280_v43 = vld [vmem:[#allocation11 + $0x30] sm:$0xff]  }
 0x132   :  { %1360 = vmatpush1.bf16.msra.mxu1 %v2196_v44  ;;  %1318 = vmatprep.subr.bf16.mxu0 %v2201_v48  ;;  %v2281_v44 = vld [vmem:[#allocation11 + $0x68] sm:$0xff]  }
 0x133   :  { %1361 = vmatprep.subr.bf16.mxu1 %v2204_v51  ;;  %v2282_v48 = vld [vmem:[#allocation11 + $0x28] sm:$0xff]   ;;  %v2283_v51 = vld [vmem:[#allocation11 + $0x60] sm:$0xff]  }
 0x135   :  { %1319 = vmatpush1.bf16.msra.mxu0 %v2199_v52  ;;  %v2284_v52 = vld [vmem:[#allocation11 + $0x20] sm:$0xff]  }
 0x136   :  { %1362 = vmatpush1.bf16.msra.mxu1 %v2202_v21  ;;  %1320 = vmatprep.subr.bf16.mxu0 %v2207_v53  ;;  %v2285_v21 = vld [vmem:[#allocation11 + $0x58] sm:$0xff]   ;;  %v2288_v53 = vld [vmem:[#allocation11 + $0x10] sm:$0xff]  }
 0x137   :  { %1363 = vmatprep.subr.bf16.mxu1 %v2210_v54  ;;  %v2289_v54 = vld [vmem:[#allocation11 + $0x48] sm:$0xff]  }
 0x139   :  { %1321 = vmatpush1.bf16.msra.mxu0 %v2205_v55  ;;  %v2290_v55 = vld [vmem:[#allocation11 + $0x8] sm:$0xff]  }
 0x13a   :  { %1364 = vmatpush1.bf16.msra.mxu1 %v2208_v56  ;;  %1322 = vmatprep.subr.bf16.mxu0 %v2213_v57  ;;  %v2291_v56 = vld [vmem:[#allocation11 + $0x40] sm:$0xff]  }
 0x13b   :  { %1365 = vmatprep.subr.bf16.mxu1 %v2216_v58  ;;  %v2292_v57 = vld [vmem:[#allocation11] sm:$0xff]   ;;  %v2293_v58 = vld [vmem:[#allocation11 + $0xf8] sm:$0xff]  }
 0x13d   :  { %1323 = vmatpush1.bf16.msra.mxu0 %v2211_v59  ;;  %v2294_v59 = vld [vmem:[#allocation11 + $0xb8] sm:$0xff]  }
 0x13e   :  { %1366 = vmatpush1.bf16.msra.mxu1 %v2214_v60  ;;  %1324 = vmatprep.subr.bf16.mxu0 %v2219_v61  ;;  %v2295_v60 = vld [vmem:[#allocation11 + $0xf0] sm:$0xff]  }
 0x13f   :  { %1367 = vmatprep.subr.bf16.mxu1 %v2222_v62  ;;  %v2296_v61 = vld [vmem:[#allocation11 + $0xb0] sm:$0xff]   ;;  %v2297_v62 = vld [vmem:[#allocation11 + $0xe8] sm:$0xff]  }
 0x141   :  { %1325 = vmatpush1.bf16.msra.mxu0 %v2217_v63  ;;  %v2298_v63 = vld [vmem:[#allocation11 + $0xa8] sm:$0xff]  }
 0x142   :  { %1368 = vmatpush1.bf16.msra.mxu1 %v2220_v0  ;;  %1326 = vmatprep.subr.bf16.mxu0 %v2225_v1  ;;  %v2299_v0 = vld [vmem:[#allocation11 + $0xe0] sm:$0xff]  }
 0x143   :  { %1369 = vmatprep.subr.bf16.mxu1 %v2228_v2  ;;  %v2300_v1 = vld [vmem:[#allocation11 + $0xa0] sm:$0xff]   ;;  %v2301_v2 = vld [vmem:[#allocation11 + $0xd8] sm:$0xff]  }
 0x145   :  { %1327 = vmatpush1.bf16.msra.mxu0 %v2223_v3  ;;  %v2302_v3 = vld [vmem:[#allocation11 + $0x98] sm:$0xff]  }
 0x146   :  { %1370 = vmatpush1.bf16.msra.mxu1 %v2226_v4  ;;  %1328 = vmatprep.subr.bf16.mxu0 %v2231_v5  ;;  %v2303_v4 = vld [vmem:[#allocation11 + $0xd0] sm:$0xff]  }
 0x147   :  { %1371 = vmatprep.subr.bf16.mxu1 %v2234_v6  ;;  %v2304_v5 = vld [vmem:[#allocation11 + $0x90] sm:$0xff]   ;;  %v2305_v6 = vld [vmem:[#allocation11 + $0xc8] sm:$0xff]  }
 0x149   :  { %1329 = vmatpush2.bf16.msra.mxu0 %v2229_v7  ;;  %v2306_v7 = vld [vmem:[#allocation11 + $0x88] sm:$0xff]  }
 0x14a   :  { %1372 = vmatpush2.bf16.msra.mxu1 %v2232_v8  ;;  %1330 = vmatprep.subr.bf16.mxu0 %v2237_v9  ;;  %v2307_v8 = vld [vmem:[#allocation11 + $0xc0] sm:$0xff]  }
 0x14b   :  { %1373 = vmatprep.subr.bf16.mxu1 %v2240_v10  ;;  %v2308_v9 = vld [vmem:[#allocation11 + $0x80] sm:$0xff]  }
 0x14c   :  { %v564_v10 = vld [vmem:[%s2531_s3] sm:$0xf] }
 0x14d   :  { %1331 = vmatpush2.bf16.msra.mxu0 %v2235_v11  ;;  %v569_v11 = vrot.slane %v564_v10, %v138_v46 }
 0x14e   :  { %1374 = vmatpush2.bf16.msra.mxu1 %v2238_v12  ;;  %1332 = vmatprep.subr.bf16.mxu0 %v2243_v13  ;;  %v573_v12 = vrot.slane %v564_v10, %v142_v49 }
 0x14f   :  { %1375 = vmatprep.subr.bf16.mxu1 %v2246_v14 }
 0x151   :  { %1333 = vmatpush2.bf16.msra.mxu0 %v2241_v15 }
 0x152   :  { %1376 = vmatpush2.bf16.msra.mxu1 %v2244_v16  ;;  %1334 = vmatprep.subr.bf16.mxu0 %v2249_v17 }
 0x153   :  { %1377 = vmatprep.subr.bf16.mxu1 %v2252_v18 }
 0x155   :  { %1335 = vmatpush2.bf16.msra.mxu0 %v2247_v19 }
 0x156   :  { %1378 = vmatpush2.bf16.msra.mxu1 %v2250_v20  ;;  %1336 = vmatprep.subr.bf16.mxu0 %v2255_v22 }
 0x157   :  { %1379 = vmatprep.subr.bf16.mxu1 %v2258_v23 }
 0x159   :  { %1337 = vmatpush2.bf16.msra.mxu0 %v2253_v24 }
 0x15a   :  { %1380 = vmatpush2.bf16.msra.mxu1 %v2256_v25  ;;  %1338 = vmatprep.subr.bf16.mxu0 %v2261_v26 }
 0x15b   :  { %1381 = vmatprep.subr.bf16.mxu1 %v2264_v27 }
 0x15d   :  { %1339 = vmatpush2.bf16.msra.mxu0 %v2259_v28 }
 0x15e   :  { %1382 = vmatpush2.bf16.msra.mxu1 %v2262_v29  ;;  %1340 = vmatprep.subr.bf16.mxu0 %v2267_v30 }
 0x15f   :  { %1383 = vmatprep.subr.bf16.mxu1 %v2270_v31 }
 0x161   :  { %1341 = vmatpush2.bf16.msra.mxu0 %v2265_v32 }
 0x162   :  { %1384 = vmatpush2.bf16.msra.mxu1 %v2268_v34  ;;  %1342 = vmatprep.subr.bf16.mxu0 %v2273_v35 }
 0x163   :  { %1385 = vmatprep.subr.bf16.mxu1 %v2276_v37 }
 0x165   :  { %1343 = vmatpush2.bf16.msra.mxu0 %v2271_v38 }
 0x166   :  { %1386 = vmatpush2.bf16.msra.mxu1 %v2274_v39  ;;  %1984 = vmatprep.subr.bf16.mxu0 %v2277_v40 }
 0x167   :  { %2006 = vmatprep.subr.bf16.mxu1 %v2293_v58 }
 0x168   :  { %1345 = vmatmul.mubr.bf16.vlgmr.msra.gmra.mxu0 %v2500_v33  ;;  %v2286_v33 = vld [vmem:[#allocation11 + $0x18] sm:$0xff]  }
 0x169   :  { %1388 = vmatmul.mubr.bf16.vlgmr.msra.gmra.mxu1 %v2502_v36  ;;  %1985 = vmatpush3.bf16.msra.mxu0 %v2278_v41  ;;  %v2287_v36 = vld [vmem:[#allocation11 + $0x50] sm:$0xff]  }
 0x16a   :  { %1986 = vmatprep.subr.bf16.mxu0 %v2279_v42  ;;  %2007 = vmatpush3.bf16.msra.mxu1 %v2294_v59 }
 0x16b   :  { %2008 = vmatprep.subr.bf16.mxu1 %v2295_v60 }
 0x16d   :  { %1987 = vmatpush3.bf16.msra.mxu0 %v2280_v43 }
 0x16e   :  { %1988 = vmatprep.subr.bf16.mxu0 %v2281_v44  ;;  %2009 = vmatpush3.bf16.msra.mxu1 %v2296_v61  ;;  %v577_v44 = vrot.slane %v564_v10, %v146_v47 }
 0x16f   :  { %2010 = vmatprep.subr.bf16.mxu1 %v2297_v62 }
 0x171   :  { %1989 = vmatpush3.bf16.msra.mxu0 %v2282_v48  ;;  %v581_v48 = vrot.slane %v564_v10, %v150_v50 }
 0x172   :  { %1990 = vmatprep.subr.bf16.mxu0 %v2283_v51  ;;  %2011 = vmatpush3.bf16.msra.mxu1 %v2298_v63 }
 0x173   :  { %2012 = vmatprep.subr.bf16.mxu1 %v2299_v0 }
 0x175   :  { %1991 = vmatpush3.bf16.msra.mxu0 %v2284_v52 }
 0x176   :  { %1992 = vmatprep.subr.bf16.mxu0 %v2285_v21  ;;  %2013 = vmatpush3.bf16.msra.mxu1 %v2300_v1 }
 0x177   :  { %2014 = vmatprep.subr.bf16.mxu1 %v2301_v2 }
 0x179   :  { %1993 = vmatpush3.bf16.msra.mxu0 %v2286_v33 }
 0x17a   :  { %1994 = vmatprep.subr.bf16.mxu0 %v2287_v36  ;;  %2015 = vmatpush3.bf16.msra.mxu1 %v2302_v3 }
 0x17b   :  { %2016 = vmatprep.subr.bf16.mxu1 %v2303_v4 }
 0x17d   :  { %1995 = vmatpush3.bf16.msra.mxu0 %v2288_v53 }
 0x17e   :  { %1996 = vmatprep.subr.bf16.mxu0 %v2289_v54  ;;  %2017 = vmatpush3.bf16.msra.mxu1 %v2304_v5 }
 0x17f   :  { %2018 = vmatprep.subr.bf16.mxu1 %v2305_v6 }
 0x181   :  { %1997 = vmatpush3.bf16.msra.mxu0 %v2290_v55 }
 0x182   :  { %1998 = vmatprep.subr.bf16.mxu0 %v2291_v56  ;;  %2019 = vmatpush3.bf16.msra.mxu1 %v2306_v7 }
 0x183   :  { %2020 = vmatprep.subr.bf16.mxu1 %v2307_v8 }
 0x185   :  { %1999 = vmatpush3.bf16.msra.mxu0 %v2292_v57 }
 0x186   :  { %2021 = vmatpush3.bf16.msra.mxu1 %v2308_v9 }
 0x1e8   :  { %v1260_v13 = vpop.f32.mrf.mxu0 }
 0x1e9   :  { %v1261_v14 = vadd.f32 %v1260_v13, %v569_v11  ;;  %v1303_v15 = vpop.f32.mrf.mxu1 }
 0x1ea   :  { %v1262_v16 = vpop.f32.mrf.mxu0 }
 0x1eb   :  { %v1263_v17 = vadd.f32 %v1262_v16, %v573_v12  ;;  %v1305_v18 = vpop.f32.mrf.mxu1  ;;  %v1304_v19 = vadd.f32 %v1303_v15, %v1261_v14  ;;  %v1946_v15 = vld [vmem:[%s2533_s5] ss:$0 sm:$0xff] }
 0x1ec   :  { %v1264_v20 = vpop.f32.mrf.mxu0 }
 0x1ed   :  { %v1306_v22 = vadd.f32 %v1305_v18, %v1263_v17  ;;  %v1265_v23 = vadd.f32 %v1264_v20, %v569_v11  ;;  %v1307_v24 = vpop.f32.mrf.mxu1 }
 0x1ee   :  { %v1266_v25 = vpop.f32.mrf.mxu0 }
 0x1ef   :  { %2325 = vtanh.f32 %v1306_v22  ;;  %v1308_v26 = vadd.f32 %v1307_v24, %v1265_v23  ;;  %v1267_v27 = vadd.f32 %v1266_v25, %v573_v12  ;;  %v1309_v46 = vpop.f32.mrf.mxu1 }
 0x1f0   :  { %2327 = vtanh.f32 %v1304_v19 }
 0x1f1   :  { %2329 = vtanh.f32 %v1308_v26  ;;  %v1310_v28 = vadd.f32 %v1309_v46, %v1267_v27 }
 0x1f3   :  { %2331 = vtanh.f32 %v1310_v28 }
 0x1fc   :  { %v2326_v49 = vpop.eup %2325 }
 0x1fd   :  { %v2328_v29 = vpop.eup %2327  ;;  %v1407_v31 = vmul.f32 0.5, %v2326_v49 }
 0x1fe   :  { %v2330_v30 = vpop.eup %2329  ;;  %v1406_v35 = vmul.f32 0.5, %v2328_v29 }
 0x1ff   :  { %v1410_v32 = vmul.f32 0.5, %v2330_v30  ;;  %v1415_v39 = vadd.f32 0.5, %v1407_v31 }
 0x200   :  { %v2332_v34 = vpop.eup %2331  ;;  %v1414_v41 = vadd.f32 0.5, %v1406_v35 }
 0x201   :  { %v1411_v37 = vmul.f32 0.5, %v2332_v34  ;;  %v1418_v38 = vadd.f32 0.5, %v1410_v32 }
 0x203   :  { %v1419_v40 = vadd.f32 0.5, %v1411_v37  ;;  %v1422_v43 = vpack.c.bf16 %v1418_v38, %v1414_v41 }
 0x205   :  { %v1423_v42 = vpack.c.bf16 %v1419_v40, %v1415_v39 }
 0x207   :  { %1721 = vmatprep.mubr.bf16.mxu0 %v1423_v42 }
 0x208   :  { %1722 = vmatmul.mubr.bf16.vlgmr.msra.gmra.mxu0 %v1422_v43 }
 0x228   :  { %v1346_v51 = vpop.f32.mrf.mxu0 }
 0x229   :  { %v1347_v52 = vadd.f32 %v1346_v51, %v577_v44  ;;  %v1389_v21 = vpop.f32.mrf.mxu1 }
 0x22a   :  { %v1348_v33 = vpop.f32.mrf.mxu0 }
 0x22b   :  { %v1349_v36 = vadd.f32 %v1348_v33, %v581_v48  ;;  %v1391_v53 = vpop.f32.mrf.mxu1  ;;  %v1390_v54 = vadd.f32 %v1389_v21, %v1347_v52 }
 0x22c   :  { %v1350_v55 = vpop.f32.mrf.mxu0 }
 0x22d   :  { %v1392_v56 = vadd.f32 %v1391_v53, %v1349_v36  ;;  %v1351_v57 = vadd.f32 %v1350_v55, %v577_v44  ;;  %v1393_v58 = vpop.f32.mrf.mxu1 }
 0x22e   :  { %v1352_v59 = vpop.f32.mrf.mxu0 }
 0x22f   :  { %2333 = vtanh.f32 %v1392_v56  ;;  %v1394_v60 = vadd.f32 %v1393_v58, %v1351_v57  ;;  %v1353_v61 = vadd.f32 %v1352_v59, %v581_v48  ;;  %v1395_v47 = vpop.f32.mrf.mxu1 }
 0x230   :  { %2335 = vtanh.f32 %v1390_v54 }
 0x231   :  { %2337 = vtanh.f32 %v1394_v60  ;;  %v1396_v45 = vadd.f32 %v1395_v47, %v1353_v61 }
 0x233   :  { %2339 = vtanh.f32 %v1396_v45 }
 0x23c   :  { %v2334_v50 = vpop.eup %2333 }
 0x23d   :  { %v2336_v62 = vpop.eup %2335  ;;  %v1409_v0 = vmul.f32 0.5, %v2334_v50 }
 0x23e   :  { %v2338_v63 = vpop.eup %2337  ;;  %v1408_v3 = vmul.f32 0.5, %v2336_v62 }
 0x23f   :  { %v1412_v1 = vmul.f32 0.5, %v2338_v63  ;;  %v1417_v6 = vadd.f32 0.5, %v1409_v0 }
 0x240   :  { %v2340_v2 = vpop.eup %2339  ;;  %v1416_v8 = vadd.f32 0.5, %v1408_v3 }
 0x241   :  { %v1413_v4 = vmul.f32 0.5, %v2340_v2  ;;  %v1420_v5 = vadd.f32 0.5, %v1412_v1 }
 0x243   :  { %v1421_v7 = vadd.f32 0.5, %v1413_v4  ;;  %v1424_v10 = vpack.c.bf16 %v1420_v5, %v1416_v8 }
 0x245   :  { %v1425_v9 = vpack.c.bf16 %v1421_v7, %v1417_v6 }
 0x247   :  { %1762 = vmatprep.mubr.bf16.mxu1 %v1425_v9 }
 0x248   :  { %1763 = vmatmul.mubr.bf16.vlgmr.msra.gmra.mxu1 %v1424_v10 }
 0x2c8   :  { %v2000_v11 = vpop.f32.mrf.mxu0 }
 0x2ca   :  { %v2001_v12 = vpop.f32.mrf.mxu0 }
 0x2cb   :  { %v2002_v14 = vadd.f32 %v2001_v12, %v2000_v11 }
 0x2cc   :  { %v2003_v13 = vpop.f32.mrf.mxu0 }
 0x2cd   :  { %v1724_v19 = vadd.f32 %v2002_v14, %v1946_v15 }
 0x2ce   :  { %v2004_v16 = vpop.f32.mrf.mxu0 }
 0x2cf   :  { %v2005_v20 = vadd.f32 %v2004_v16, %v2003_v13 }
 0x2d1   :  { %v1727_v26 = vadd.f32 %v2005_v20, %v1946_v15 }
 0x308   :  { %v2022_v17 = vpop.f32.mrf.mxu1 }
 0x30a   :  { %v2023_v18 = vpop.f32.mrf.mxu1 }
 0x30b   :  { %v2024_v22 = vadd.f32 %v2023_v18, %v2022_v17 }
 0x30c   :  { %v2025_v23 = vpop.f32.mrf.mxu1 }
 0x30d   :  { %v1765_v24 = vadd.f32 %v2024_v22, %v1724_v19 }
 0x30e   :  { %v2026_v25 = vpop.f32.mrf.mxu1 }
 0x30f   :  { %2341 = vtanh.f32 %v1765_v24  ;;  %v2027_v27 = vadd.f32 %v2026_v25, %v2025_v23 }
 0x311   :  { %v1768_v46 = vadd.f32 %v2027_v27, %v1727_v26 }
 0x313   :  { %2343 = vtanh.f32 %v1768_v46 }
 0x31c   :  { %v2342_v28 = vpop.eup %2341 }
 0x31d   :  { %v1773_v49 = vmul.f32 0.5, %v2342_v28 }
 0x31f   :  { %v1775_v29 = vadd.f32 0.5, %v1773_v49 }
 0x320   :  { %v2344_v30 = vpop.eup %2343 }
 0x321   :  { %1777 = vst [vmem:[%s2536_s8] sm:$0xff] %v1775_v29  ;;  %v1774_v31 = vmul.f32 0.5, %v2344_v30 }
 0x323   :  { %v1776_v32 = vadd.f32 0.5, %v1774_v31 }
 0x325   :  { %1778 = vst [vmem:[%s2536_s8 + $0x8] sm:$0xff] %v1776_v32 }
 0x326   :  { %1783 = vsyncpa [#allocation8], 1 }
 0x327   :  { %1784 = vsyncpa [#allocation10], 1 }

</bundles_post_ra>
